<compile_context>
chip_gen: v7x
topology: tpu7x:2x2x1
jax: 0.10.0
libtpu: 0.0.40
codegen_flags: <defaults>
</compile_context>

<pallas_src>
import math

import jax
import jax.numpy as jnp
from jax.experimental import pallas as pl
from jax.experimental.pallas import tpu as pltpu

_HI = jax.lax.Precision.HIGHEST


# ---------------------------------------------------------------------------
# model config (matches the PyTorch flags object)
# ---------------------------------------------------------------------------
class Flags:
    use_conv = True
    linear = [8, 32, 32, 64]          # geometry dim -> hidden -> hidden -> L0
    conv_out_channel = [4, 4]
    conv_kernel_size = [4, 3]
    conv_stride = [2, 1]


# ---------------------------------------------------------------------------
# pure-JAX conv-transpose stack (used both for the offline fold and for the
# correctness reference)
# ---------------------------------------------------------------------------
def _apply_conv_stack(x, conv_ws, conv_bs, conv_cfgs, final_w, final_b):
    """x: (N, L0) f32 -> (N, Lout) f32, PyTorch ConvTranspose1d semantics."""
    xc = x[:, None, :]                                       # (N, 1, L)
    for w, b, (cin, cout, K, st, pad) in zip(conv_ws, conv_bs, conv_cfgs):
        N, _, L = xc.shape
        if st > 1:                                           # zero-dilate input
            z = jnp.zeros((N, cin, L, st), xc.dtype).at[:, :, :, 0].set(xc)
            xd = z.reshape(N, cin, L * st)[:, :, : (L - 1) * st + 1]
        else:
            xd = xc
        w_conv = jnp.transpose(jnp.flip(w, 2), (1, 0, 2))    # (cout, cin, K)
        e = K - 1 - pad
        xp = jnp.pad(xd, ((0, 0), (0, 0), (e, e)))
        Lo = (L - 1) * st - 2 * pad + K
        y = jnp.zeros((N, cout, Lo), jnp.float32)
        for k in range(K):
            y = y + jnp.einsum("bcl,oc->bol", xp[:, :, k:k + Lo],
                               w_conv[:, :, k], precision=_HI)
        xc = y + b[None, :, None]
    out = jnp.einsum("bcl,c->bl", xc, final_w, precision=_HI)
    return out + final_b[0]


# ---------------------------------------------------------------------------
# fused kernel: MLP (BN folded) -> tanh -> folded conv matmul
# ---------------------------------------------------------------------------
def _build_kernel(n_lin, use_conv):
    def kernel(*refs):
        o_ref = refs[-1]
        ins = refs[:-1]
        pos = 0
        g_ref = ins[pos]; pos += 1
        lin_w, lin_b = [], []
        for _ in range(n_lin):
            lin_w.append(ins[pos]); lin_b.append(ins[pos + 1]); pos += 2
        if use_conv:
            wc_ref = ins[pos]
            bc_ref = ins[pos + 1]

        h = g_ref[...]
        for i in range(n_lin):
            y = jnp.dot(h, lin_w[i][...],
                        preferred_element_type=jnp.float32,
                        precision=_HI) + lin_b[i][...]
            h = jnp.tanh(y) if i == n_lin - 1 else jnp.maximum(y, 0.0)

        if use_conv:
            # whole ConvTranspose1d stack + final Conv1d folded into one matmul
            h = jnp.dot(h, wc_ref[...],
                        preferred_element_type=jnp.float32,
                        precision=_HI) + bc_ref[...]
        o_ref[...] = h

    return kernel


# ---------------------------------------------------------------------------
# deterministic raw parameter init (PyTorch-equivalent layouts)
# ---------------------------------------------------------------------------
def init_params(key, flags):
    p = {"lin_w": [], "lin_b": [], "bn": [],
         "conv_w": [], "conv_b": [], "conv_cfg": [],
         "final_w": None, "final_b": None}

    n_lin = len(flags.linear) - 1
    for ind, fan_in in enumerate(flags.linear[:-1]):
        fan_out = flags.linear[ind + 1]
        key, k1, k2, k3, k4, k5, k6 = jax.random.split(key, 7)
        bound = 1.0 / math.sqrt(fan_in)
        W = jax.random.uniform(k1, (fan_out, fan_in), jnp.float32, -bound, bound)
        b = jax.random.uniform(k2, (fan_out,), jnp.float32, -bound, bound)
        p["lin_w"].append(W)
        p["lin_b"].append(b)
        if ind != n_lin - 1:
            gamma = jax.random.uniform(k3, (fan_out,), jnp.float32, 0.5, 1.5)
            beta = jax.random.uniform(k4, (fan_out,), jnp.float32, -0.1, 0.1)
            mu = jax.random.uniform(k5, (fan_out,), jnp.float32, -0.1, 0.1)
            var = jax.random.uniform(k6, (fan_out,), jnp.float32, 0.5, 1.5)
            p["bn"].append((gamma, beta, mu, var))
        else:
            p["bn"].append(None)

    in_ch = 1
    for out_ch, ks, st in zip(flags.conv_out_channel, flags.conv_kernel_size,
                              flags.conv_stride):
        if st == 2:
            pad = int(ks / 2 - 1)
        elif st == 1:
            pad = int((ks - 1) / 2)
        else:
            raise ValueError("only stride 1 or 2 supported")
        key, k1, k2 = jax.random.split(key, 3)
        bound = 1.0 / math.sqrt(in_ch * ks)
        W = jax.random.uniform(k1, (in_ch, out_ch, ks), jnp.float32, -bound, bound)
        b = jax.random.uniform(k2, (out_ch,), jnp.float32, -bound, bound)
        p["conv_w"].append(W)
        p["conv_b"].append(b)
        p["conv_cfg"].append((in_ch, out_ch, ks, st, pad))
        in_ch = out_ch

    key, k1, k2 = jax.random.split(key, 3)
    bound = 1.0 / math.sqrt(in_ch)
    p["final_w"] = jax.random.uniform(k1, (in_ch,), jnp.float32, -bound, bound)
    p["final_b"] = jax.random.uniform(k2, (1,), jnp.float32, -bound, bound)
    return p


# ---------------------------------------------------------------------------
# offline folding: BN -> Linear, conv stack -> single (L0, Lout) matmul
# ---------------------------------------------------------------------------
def prepare_fused_params(params, flags, eps=1e-5):
    fused = {"lin_w": [], "lin_b": [], "Wc": None, "bc": None}
    for W, b, bn in zip(params["lin_w"], params["lin_b"], params["bn"]):
        if bn is not None:
            gamma, beta, mu, var = bn
            scale = gamma * jax.lax.rsqrt(var + eps)
            W = W * scale[:, None]
            b = (b - mu) * scale + beta
        fused["lin_w"].append(jnp.transpose(W))              # (in, out)
        fused["lin_b"].append(b.reshape(1, -1))

    if flags.use_conv:
        L0 = flags.linear[-1]
        stack = lambda x: _apply_conv_stack(
            x, params["conv_w"], params["conv_b"], params["conv_cfg"],
            params["final_w"], params["final_b"])
        bc = stack(jnp.zeros((1, L0), jnp.float32))          # (1, Lout)
        Wc = stack(jnp.eye(L0, dtype=jnp.float32)) - bc      # (L0, Lout)
        fused["Wc"] = Wc
        fused["bc"] = bc
    return fused


# ---------------------------------------------------------------------------
# forward pass: one fused pallas_call
# ---------------------------------------------------------------------------
def forward(G, fused, flags):
    B, Din = G.shape
    n_lin = len(fused["lin_w"])
    use_conv = flags.use_conv
    Lout = fused["Wc"].shape[1] if use_conv else fused["lin_w"][-1].shape[1]

    args = [G]
    for i in range(n_lin):
        args += [fused["lin_w"][i], fused["lin_b"][i]]
    if use_conv:
        args += [fused["Wc"], fused["bc"]]

    kernel = _build_kernel(n_lin, use_conv)
    out_shape = jax.ShapeDtypeStruct((B, Lout), jnp.float32)

    TB = 256  # B-tile for the large-batch / megacore path
    if B >= 2 * TB and B % TB == 0:
        # Large batch: tile over B, mark the axis 'parallel' (2 TCs on v7x).
        in_specs = [pl.BlockSpec((TB, Din), lambda i: (i, 0))]
        for a in args[1:]:
            in_specs.append(
                pl.BlockSpec(a.shape, lambda i, _nd=a.ndim: (0,) * _nd))
        out = pl.pallas_call(
            kernel,
            out_shape=out_shape,
            grid=(B // TB,),
            in_specs=in_specs,
            out_specs=pl.BlockSpec((TB, Lout), lambda i: (i, 0)),
            compiler_params=pltpu.CompilerParams(
                dimension_semantics=("parallel",)),
        )(*args)
    else:
        # Small batch: single block, whole forward in one kernel invocation.
        vmem = pl.BlockSpec(memory_space=pltpu.MemorySpace.VMEM)
        out = pl.pallas_call(
            kernel,
            out_shape=out_shape,
            in_specs=[vmem] * len(args),
            out_specs=vmem,
        )(*args)

    if use_conv:
        # torch's out.squeeze() on (B, 1, Lout): channel already gone here,
        # squeeze remaining singleton dims (B==1 and/or Lout==1).
        out = jnp.squeeze(out)
    return out


# ---------------------------------------------------------------------------
# pure-JAX reference (raw params, explicit BN) for correctness check
# ---------------------------------------------------------------------------
def reference_forward(G, params, flags, eps=1e-5):
    h = G
    n = len(params["lin_w"])
    for i in range(n):
        y = jnp.dot(h, jnp.transpose(params["lin_w"][i]), precision=_HI)
        y = y + params["lin_b"][i]
        if i != n - 1:
            gamma, beta, mu, var = params["bn"][i]
            y = (y - mu) * gamma * jax.lax.rsqrt(var + eps) + beta
            h = jnp.maximum(y, 0.0)
        else:
            h = y
    h = jnp.tanh(h)
    if not flags.use_conv:
        return h
    out = _apply_conv_stack(h, params["conv_w"], params["conv_b"],
                            params["conv_cfg"], params["final_w"],
                            params["final_b"])
    return jnp.squeeze(out)


# ---------------------------------------------------------------------------
if __name__ == "__main__":
    flags = Flags()
    key = jax.random.PRNGKey(0)
    key, gkey = jax.random.split(key)

    params = init_params(key, flags)
    fused = prepare_fused_params(params, flags)

    B = 2
    G = jax.random.normal(gkey, (B, flags.linear[0]), jnp.float32)

    fwd = jax.jit(lambda g: forward(g, fused, flags))
    out = jax.block_until_ready(fwd(G))

    ref = jax.block_until_ready(reference_forward(G, params, flags))

    L = flags.linear[-1]
    for st in flags.conv_stride:
        if st == 2:
            L *= 2
    assert out.shape == (B, L), out.shape
    assert bool(jnp.all(jnp.isfinite(out)))
    err = float(jnp.max(jnp.abs(out - ref)))
    assert err < 1e-3, f"max abs error vs reference: {err}"
    print("KERNEL_OK")
</pallas_src>

<mosaic_0001>
module attributes {stable_mosaic.version = 11 : i64} {
  func.func @kernel(%arg0: memref<2x8xf32, #tpu.memory_space<vmem>>, %arg1: memref<8x32xf32, #tpu.memory_space<vmem>>, %arg2: memref<1x32xf32, #tpu.memory_space<vmem>>, %arg3: memref<32x32xf32, #tpu.memory_space<vmem>>, %arg4: memref<1x32xf32, #tpu.memory_space<vmem>>, %arg5: memref<32x64xf32, #tpu.memory_space<vmem>>, %arg6: memref<1x64xf32, #tpu.memory_space<vmem>>, %arg7: memref<64x128xf32, #tpu.memory_space<vmem>>, %arg8: memref<1x128xf32, #tpu.memory_space<vmem>>, %arg9: memref<2x128xf32, #tpu.memory_space<vmem>>) attributes {dimension_semantics = [], scalar_prefetch = 0 : i64, scratch_operands = 0 : i64, tpu.core_type = #tpu.core_type<tc>} {
    %c0 = arith.constant 0 : index
    %c0_0 = arith.constant 0 : index
    %0 = vector.load %arg0[%c0, %c0_0] : memref<2x8xf32, #tpu.memory_space<vmem>>, vector<2x8xf32>
    %c0_1 = arith.constant 0 : index
    %c0_2 = arith.constant 0 : index
    %1 = vector.load %arg1[%c0_1, %c0_2] : memref<8x32xf32, #tpu.memory_space<vmem>>, vector<8x32xf32>
    %cst = arith.constant dense<0.000000e+00> : vector<2x32xf32>
    %2 = tpu.matmul %0, %1, %cst {dimension_numbers = #tpu.dot_dimension_numbers<[1], [0], [0], [1], [0, 0, 1, 1], [], []>, precision = #tpu.contract_precision<fp32>} : vector<2x8xf32>, vector<8x32xf32>, vector<2x32xf32> -> vector<2x32xf32>
    %c0_3 = arith.constant 0 : index
    %c0_4 = arith.constant 0 : index
    %3 = vector.load %arg2[%c0_3, %c0_4] : memref<1x32xf32, #tpu.memory_space<vmem>>, vector<1x32xf32>
    %4 = vector.broadcast %3 : vector<1x32xf32> to vector<2x32xf32>
    %5 = arith.addf %2, %4 : vector<2x32xf32>
    %cst_5 = arith.constant 0.000000e+00 : f32
    %6 = vector.broadcast %cst_5 : f32 to vector<2x32xf32>
    %7 = arith.maximumf %5, %6 : vector<2x32xf32>
    %c0_6 = arith.constant 0 : index
    %c0_7 = arith.constant 0 : index
    %8 = vector.load %arg3[%c0_6, %c0_7] : memref<32x32xf32, #tpu.memory_space<vmem>>, vector<32x32xf32>
    %cst_8 = arith.constant dense<0.000000e+00> : vector<2x32xf32>
    %9 = tpu.matmul %7, %8, %cst_8 {dimension_numbers = #tpu.dot_dimension_numbers<[1], [0], [0], [1], [0, 0, 1, 1], [], []>, precision = #tpu.contract_precision<fp32>} : vector<2x32xf32>, vector<32x32xf32>, vector<2x32xf32> -> vector<2x32xf32>
    %c0_9 = arith.constant 0 : index
    %c0_10 = arith.constant 0 : index
    %10 = vector.load %arg4[%c0_9, %c0_10] : memref<1x32xf32, #tpu.memory_space<vmem>>, vector<1x32xf32>
    %11 = vector.broadcast %10 : vector<1x32xf32> to vector<2x32xf32>
    %12 = arith.addf %9, %11 : vector<2x32xf32>
    %cst_11 = arith.constant 0.000000e+00 : f32
    %13 = vector.broadcast %cst_11 : f32 to vector<2x32xf32>
    %14 = arith.maximumf %12, %13 : vector<2x32xf32>
    %c0_12 = arith.constant 0 : index
    %c0_13 = arith.constant 0 : index
    %15 = vector.load %arg5[%c0_12, %c0_13] : memref<32x64xf32, #tpu.memory_space<vmem>>, vector<32x64xf32>
    %cst_14 = arith.constant dense<0.000000e+00> : vector<2x64xf32>
    %16 = tpu.matmul %14, %15, %cst_14 {dimension_numbers = #tpu.dot_dimension_numbers<[1], [0], [0], [1], [0, 0, 1, 1], [], []>, precision = #tpu.contract_precision<fp32>} : vector<2x32xf32>, vector<32x64xf32>, vector<2x64xf32> -> vector<2x64xf32>
    %c0_15 = arith.constant 0 : index
    %c0_16 = arith.constant 0 : index
    %17 = vector.load %arg6[%c0_15, %c0_16] : memref<1x64xf32, #tpu.memory_space<vmem>>, vector<1x64xf32>
    %18 = vector.broadcast %17 : vector<1x64xf32> to vector<2x64xf32>
    %19 = arith.addf %16, %18 : vector<2x64xf32>
    %20 = math.tanh %19 : vector<2x64xf32>
    %c0_17 = arith.constant 0 : index
    %c0_18 = arith.constant 0 : index
    %21 = vector.load %arg7[%c0_17, %c0_18] : memref<64x128xf32, #tpu.memory_space<vmem>>, vector<64x128xf32>
    %cst_19 = arith.constant dense<0.000000e+00> : vector<2x128xf32>
    %22 = tpu.matmul %20, %21, %cst_19 {dimension_numbers = #tpu.dot_dimension_numbers<[1], [0], [0], [1], [0, 0, 1, 1], [], []>, precision = #tpu.contract_precision<fp32>} : vector<2x64xf32>, vector<64x128xf32>, vector<2x128xf32> -> vector<2x128xf32>
    %c0_20 = arith.constant 0 : index
    %c0_21 = arith.constant 0 : index
    %23 = vector.load %arg8[%c0_20, %c0_21] : memref<1x128xf32, #tpu.memory_space<vmem>>, vector<1x128xf32>
    %24 = vector.broadcast %23 : vector<1x128xf32> to vector<2x128xf32>
    %25 = arith.addf %22, %24 : vector<2x128xf32>
    %c0_22 = arith.constant 0 : index
    %c0_23 = arith.constant 0 : index
    %26 = vector.load %arg9[%c0_22, %c0_23] : memref<2x128xf32, #tpu.memory_space<vmem>>, vector<2x128xf32>
    tpu.vector_store %arg9[%c0_22, %c0_23], %25 {strides = array<i32>} : memref<2x128xf32, #tpu.memory_space<vmem>>, vector<2x128xf32>,
    return
  }
}

</mosaic_0001>

<bundles_post_ra>
// kernel: _lambda_.1
= control target key start
LH: loop header
LB: loop body
LE: loop exit
PB: predicated region body
PF: predicated region fallthrough
CT: control target
= control target key end

     0   :  { %14 = vsyncpa [#allocation3], 0  ;;  %s3179_s0 = inlined_call_operand.hbm [shape: f32[2,8], index: 0, kind: input, shape index: {}]   ;;  %s3180_s1 = inlined_call_operand.hbm [shape: f32[8,32], index: 1, kind: input, shape index: {}]   ;;  %s3181_s2 = inlined_call_operand.vmem [shape: f32[1,32], index: 2, kind: input, shape index: {}]   ;;  %s3182_s3 = inlined_call_operand.hbm [shape: f32[32,32], index: 3, kind: input, shape index: {}]   ;;  %s3183_s4 = inlined_call_operand.vmem [shape: f32[1,32], index: 4, kind: input, shape index: {}]   ;;  %s3184_s5 = inlined_call_operand.hbm [shape: f32[32,64], index: 5, kind: input, shape index: {}]   ;;  %s3185_s6 = inlined_call_operand.vmem [shape: f32[1,64], index: 6, kind: input, shape index: {}]   ;;  %s3186_s7 = inlined_call_operand.hbm [shape: f32[64,128], index: 7, kind: input, shape index: {}]   ;;  %s3187_s8 = inlined_call_operand.vmem [shape: f32[1,128], index: 8, kind: input, shape index: {}]   ;;  %s3188_s9 = inlined_call_operand.hbm [shape: f32[2,128], index: 9, kind: output, shape index: {}]  }
   0x1   :  { %15 = vsyncpa [#allocation6], 0 }
   0x2   :  { %16 = vsyncpa [#allocation9], 0 }
   0x3   :  { %17 = vsyncpa [#allocation4], 0  ;;  %s2876_s30 = smov [#allocation5]   ;;  %s2736_s13 = scalar_lea.hbm %s3180_s1, 128 }
   0x4   :  { %s34_s10 = sshll.u32 %s2876_s30, 4  ;;  %p2737_p0 = scmp.ne.s32.totalorder %s3180_s1, %s2736_s13  ;;  %s35_s10 = int_to_ptr.vmem [resolvable:$true] %s34_s10 }
   0x5   :  { %p2740_p1 = scmp.lt.u32.totalorder %s2736_s13, %s3180_s1 }
   0x7   :  { %p2742_p2 = pnand %p2740_p1, %p2737_p0 }
   0x9   :  { %2745 = shalt.err (!%p2742_p2)
}
   0xa   :  { %s2746_s18 = scalar_lea.vmem %s35_s10, 128  ;;  %p2751_p4 = scmp.lt.s32.totalorder %s35_s10, %s35_s10 }
   0xb   :  { %p2747_p3 = scmp.ne.s32.totalorder %s35_s10, %s2746_s18  ;;  %p2752_p5 = scmp.lt.s32.totalorder %s2746_s18, %s2746_s18 }
   0xd   :  { %p2753_p6 = por %p2752_p5, %p2751_p4 }
   0xf   :  { %p2754_p7 = pnand %p2753_p6, %p2747_p3 }
  0x11   :  { %2757 = shalt.err (!%p2754_p7)
}
  0x12   :  { %37 = dma.hbm_to_vmem [thread:$0]  %s3180_s1, 128, %s35_s10, [#allocation6]  }
  0x13   :  { %s2877_s21 = smov [#allocation8]   ;;  %s2878_s23 = smov [#allocation2]  }
  0x14   :  { %s59_s22 = sshll.u32 %s2877_s21, 4  ;;  %s24_s24 = sshll.u32 %s2878_s23, 4  ;;  %s60_s22 = int_to_ptr.vmem [resolvable:$true] %s59_s22  ;;  %s25_s24 = int_to_ptr.vmem [resolvable:$true] %s24_s24 }
  0x15   :  { %s2758_s27 = scalar_lea.hbm %s3184_s5, 512 }
  0x16   :  { %p2759_p8 = scmp.ne.s32.totalorder %s3184_s5, %s2758_s27  ;;  %p2762_p9 = scmp.lt.u32.totalorder %s2758_s27, %s3184_s5 }
  0x18   :  { %p2764_p10 = pnand %p2762_p9, %p2759_p8 }
  0x1a   :  { %2767 = shalt.err (!%p2764_p10)
}
  0x1b   :  { %s2768_s1 = scalar_lea.vmem %s60_s22, 512  ;;  %p2773_p12 = scmp.lt.s32.totalorder %s60_s22, %s60_s22 }
  0x1c   :  { %p2769_p11 = scmp.ne.s32.totalorder %s60_s22, %s2768_s1  ;;  %p2774_p13 = scmp.lt.s32.totalorder %s2768_s1, %s2768_s1 }
  0x1e   :  { %p2775_p0 = por %p2774_p13, %p2773_p12 }
  0x20   :  { %p2776_p1 = pnand %p2775_p0, %p2769_p11 }
  0x22   :  { %2779 = shalt.err (!%p2776_p1)
}
  0x23   :  { %s2879_s10 = smov 128   ;;  %s2880_s12 = smov 8  }
  0x24   :  { %65 = dma.hbm_to_vmem [thread:$0]  %s3184_s5, 512, %s60_s22, [#allocation9], %s2879_s10, %s2879_s10, %s2880_s12  }
  0x25   :  { %s2780_s17 = scalar_lea.hbm %s3179_s0, 32 }
  0x26   :  { %p2781_p2 = scmp.ne.s32.totalorder %s3179_s0, %s2780_s17  ;;  %p2784_p3 = scmp.lt.u32.totalorder %s2780_s17, %s3179_s0 }
  0x28   :  { %p2786_p4 = pnand %p2784_p3, %p2781_p2 }
  0x2a   :  { %2789 = shalt.err (!%p2786_p4)
}
  0x2b   :  { %s2790_s23 = scalar_lea.vmem %s25_s24, 32  ;;  %p2795_p6 = scmp.lt.s32.totalorder %s25_s24, %s25_s24 }
  0x2c   :  { %p2791_p5 = scmp.ne.s32.totalorder %s25_s24, %s2790_s23  ;;  %p2796_p7 = scmp.lt.s32.totalorder %s2790_s23, %s2790_s23 }
  0x2e   :  { %p2797_p8 = por %p2796_p7, %p2795_p6 }
  0x30   :  { %p2798_p9 = pnand %p2797_p8, %p2791_p5 }
  0x32   :  { %2801 = shalt.err (!%p2798_p9)
}
  0x33   :  { %27 = dma.hbm_to_vmem [thread:$0]  %s3179_s0, 32, %s25_s24, [#allocation3]  }
  0x34   :  { %s2881_s25 = smov [#allocation7]   ;;  %s2882_s27 = smov [#allocation10]  }
  0x35   :  { %s45_s26 = sshll.u32 %s2881_s25, 4  ;;  %s73_s28 = sshll.u32 %s2882_s27, 4  ;;  %s46_s26 = int_to_ptr.vmem [resolvable:$true] %s45_s26  ;;  %s74_s28 = int_to_ptr.vmem [resolvable:$true] %s73_s28 }
  0x36   :  { %s2802_s11 = scalar_lea.hbm %s3182_s3, 512 }
  0x37   :  { %p2803_p10 = scmp.ne.s32.totalorder %s3182_s3, %s2802_s11  ;;  %p2806_p11 = scmp.lt.u32.totalorder %s2802_s11, %s3182_s3 }
  0x39   :  { %p2808_p12 = pnand %p2806_p11, %p2803_p10 }
  0x3b   :  { %2811 = shalt.err (!%p2808_p12)
}
  0x3c   :  { %s2812_s0 = scalar_lea.vmem %s46_s26, 512  ;;  %p2817_p0 = scmp.lt.s32.totalorder %s46_s26, %s46_s26 }
  0x3d   :  { %p2813_p13 = scmp.ne.s32.totalorder %s46_s26, %s2812_s0  ;;  %p2818_p1 = scmp.lt.s32.totalorder %s2812_s0, %s2812_s0 }
  0x3f   :  { %p2819_p2 = por %p2818_p1, %p2817_p0 }
  0x41   :  { %p2820_p3 = pnand %p2819_p2, %p2813_p13 }
  0x43   :  { %2823 = shalt.err (!%p2820_p3)
}
  0x44   :  { %51 = dma.hbm_to_vmem [thread:$0]  %s3182_s3, 512, %s46_s26, [#allocation6], %s2879_s10, %s2879_s10, %s2880_s12  }
  0x45   :  { %s2824_s19 = scalar_lea.hbm %s3186_s7, 1024 }
  0x46   :  { %p2825_p4 = scmp.ne.s32.totalorder %s3186_s7, %s2824_s19  ;;  %p2828_p5 = scmp.lt.u32.totalorder %s2824_s19, %s3186_s7 }
  0x48   :  { %p2830_p6 = pnand %p2828_p5, %p2825_p4 }
  0x4a   :  { %2833 = shalt.err (!%p2830_p6)
}
  0x4b   :  { %s2834_s22 = scalar_lea.vmem %s74_s28, 1024  ;;  %p2839_p8 = scmp.lt.s32.totalorder %s74_s28, %s74_s28 }
  0x4c   :  { %p2835_p7 = scmp.ne.s32.totalorder %s74_s28, %s2834_s22  ;;  %p2840_p9 = scmp.lt.s32.totalorder %s2834_s22, %s2834_s22 }
  0x4e   :  { %p2841_p10 = por %p2840_p9, %p2839_p8 }
  0x50   :  { %p2842_p11 = pnand %p2841_p10, %p2835_p7 }
  0x52   :  { %2845 = shalt.err (!%p2842_p11)
}
  0x53   :  { %79 = dma.hbm_to_vmem [thread:$0]  %s3186_s7, 1024, %s74_s28, [#allocation9], %s2879_s10, %s2879_s10, %s2880_s12  }
  0x54   :  { %2868 = dma.done.wait [#allocation3], 32  }
  0x55   :  { %2869 = vsyncadd [#allocation3], 4294967264 }
  0x56   :  { %2870 = dma.done.wait [#allocation6], 640  }
  0x57   :  { %2871 = vsyncadd [#allocation6], 4294966656 }
  0x58   :  { %2872 = dma.done.wait [#allocation9], 1536  }
  0x59   :  { %2873 = vsyncadd [#allocation9], 4294965760  ;;  %v2883_v0 = vmov 0.0   ;;  %vm2884_vm0 = vmmov 0   ;;  %vm106_vm1 = vcmask 64512   ;;  %v98_v1 = vld [vmem:[#allocation5] sm:$0xff] }
  0x5a   :  { %2267 = vmatprep.subr.mxu0 %v2883_v0  ;;  %2269 = vmatprep.mubr.msk.f32.mxu0 %vm2884_vm0, %v2883_v0  ;;  %v97_v2 = vld [vmem:[#allocation2] sm:$0x3]  ;;  %v111_v3 = vand.u32 4294901760, %v98_v1  ;;  %v557_v14 = vld [vmem:[#allocation7] sm:$0xff]  ;;  %v558_v15 = vld [vmem:[#allocation7 + $0x8] sm:$0xff]  ;;  %v2885_v37 = vmov 0.0|0.0  }
  0x5b   :  { %2262 = vmatprep.subr.mxu1 %v2883_v0  ;;  %2264 = vmatprep.mubr.msk.f32.mxu1 %vm2884_vm0, %v2883_v0  ;;  %v108_v4 = vsel %vm106_vm1, %v97_v2, 0  ;;  %v573_v16 = vand.u32 4294901760, %v557_v14  ;;  %v576_v17 = vand.u32 4294901760, %v558_v15  ;;  %v559_v20 = vld [vmem:[#allocation7 + $0x10] sm:$0xff]  ;;  %v560_v21 = vld [vmem:[#allocation7 + $0x18] sm:$0xff]  ;;  %vm568_vm2 = vcmask 261120  }
  0x5c   :  { %v176_v5 = vand.u32 4294901760, %v108_v4  ;;  %v188_v6 = vsub.f32 %v98_v1, %v111_v3  ;;  %2263 = vmatpush3.msra.mxu1 %v111_v3  ;;  %v579_v24 = vand.u32 4294901760, %v559_v20  ;;  %v582_v25 = vand.u32 4294901760, %v560_v21  ;;  %v2132_v49 = vld [vmem:[%s3181_s2] ss:$0 sm:$0xff]  ;;  %v1058_v61 = vld [vmem:[#allocation8] sm:$0xff] }
  0x5d   :  { %v653_v18 = vsub.f32 %v557_v14, %v573_v16  ;;  %v660_v19 = vsub.f32 %v558_v15, %v576_v17  ;;  %2544 = vmatprep.subr.bf16.mxu1 %v2885_v37  ;;  %v2539_v41 = vpack.c.bf16 %v576_v17, %v573_v16  ;;  %v1059_v62 = vld [vmem:[#allocation8 + $0x8] sm:$0xff]  ;;  %v1073_v63 = vand.u32 4294901760, %v1058_v61  ;;  %s2886_s28 = smov [#allocation11]  }
  0x5e   :  { %v177_v7 = vsub.f32 %v108_v4, %v176_v5  ;;  %v189_v8 = vand.u32 4294901760, %v188_v6  ;;  %v667_v28 = vsub.f32 %v559_v20, %v579_v24  ;;  %v674_v29 = vsub.f32 %v560_v21, %v582_v25  ;;  %s2121_s29 = sshll.u32 %s2886_s28, 4  ;;  %s2122_s29 = int_to_ptr.vmem [resolvable:$true] %s2121_s29 }
  0x5f   :  { %v654_v22 = vand.u32 4294901760, %v653_v18  ;;  %v661_v23 = vand.u32 4294901760, %v660_v19  ;;  %v2551_v42 = vpack.c.bf16 %v660_v19, %v653_v18  ;;  %v2542_v43 = vpack.c.bf16 %v582_v25, %v579_v24  ;;  %s2846_s30 = scalar_lea.vmem %s2122_s29, 32  ;;  %p2851_p13 = scmp.lt.s32.totalorder %s2122_s29, %s2122_s29 }
  0x60   :  { %v178_v9 = vand.u32 4294901760, %v177_v7  ;;  %v190_v10 = vsub.f32 %v188_v6, %v189_v8  ;;  %v668_v32 = vand.u32 4294901760, %v667_v28  ;;  %v675_v33 = vand.u32 4294901760, %v674_v29  ;;  %p2847_p12 = scmp.ne.s32.totalorder %s2122_s29, %s2846_s30  ;;  %p2852_p0 = scmp.lt.s32.totalorder %s2846_s30, %s2846_s30 }
  0x61   :  { %v655_v26 = vsub.f32 %v653_v18, %v654_v22  ;;  %v662_v27 = vsub.f32 %v660_v19, %v661_v23  ;;  %v2554_v44 = vpack.c.bf16 %v674_v29, %v667_v28  ;;  %v2563_v45 = vpack.c.bf16 %v661_v23, %v654_v22 }
  0x62   :  { %v179_v11 = vsub.f32 %v177_v7, %v178_v9  ;;  %v191_v12 = vand.u32 4294901760, %v190_v10  ;;  %v669_v35 = vsub.f32 %v667_v28, %v668_v32  ;;  %v676_v36 = vsub.f32 %v674_v29, %v675_v33  ;;  %p2853_p1 = por %p2852_p0, %p2851_p13 }
  0x63   :  { %v656_v30 = vand.u32 4294901760, %v655_v26  ;;  %v663_v31 = vand.u32 4294901760, %v662_v27  ;;  %v2566_v46 = vpack.c.bf16 %v675_v33, %v668_v32  ;;  %v1076_v1 = vand.u32 4294901760, %v1059_v62  ;;  %v2133_v32 = vld [vmem:[%s3183_s4] ss:$0 sm:$0xff] }
  0x64   :  { %v180_v13 = vand.u32 4294901760, %v179_v11  ;;  %2268 = vmatpush3.msra.mxu0 %v191_v12  ;;  %v670_v38 = vand.u32 4294901760, %v669_v35  ;;  %v677_v39 = vand.u32 4294901760, %v676_v36  ;;  %vm1573_vm3 = vcmask 523264   ;;  %p2854_p2 = pnand %p2853_p1, %p2847_p12 }
  0x65   :  { %2270 = vmatmul.mubr.f32.vlgmr.msra.gmra.mrb[0].mxu0 %v176_v5  ;;  %2272 = vmatprep.subr.mxu0 %v2883_v0  ;;  %v2545_v34 = vpack.c.bf16 %v663_v31, %v656_v30  ;;  %v3058_v2 = vpack.c.bf16 %v1076_v1, %v1073_v63  ;;  %v1160_v4 = vsub.f32 %v1059_v62, %v1076_v1  ;;  %v1565_v1 = vld [vmem:[#allocation10 + $0x38] sm:$0xff] }
  0x66   :  { %2273 = vmatpush3.msra.mxu0 %v188_v6  ;;  %2274 = vmatprep.mubr.msk.f32.mxu0 %vm2884_vm0, %v2883_v0  ;;  %v2548_v40 = vpack.c.bf16 %v677_v39, %v670_v38  ;;  %v1061_v6 = vld [vmem:[#allocation8 + $0x18] sm:$0xff] }
  0x67   :  { %2277 = vmatprep.subr.mxu0 %v2883_v0  ;;  %2265 = vmatmul.mubr.f32.vlgmr.msra.gmra.mrb[0].mxu1 %v180_v13  ;;  %v1161_v10 = vand.u32 4294901760, %v1160_v4 }
  0x68   :  { %2311 = vmatprep.mubr.msk.f32.mxu1 %vm2884_vm0, %v2883_v0  ;;  %2546 = vmatpush3.bf16.msra.mxu1 %v2545_v34 }
  0x69   :  { %2547 = vmatprep.subr.bf16.mxu1 %v2885_v37  ;;  %v1162_v15 = vsub.f32 %v1160_v4, %v1161_v10 }
  0x6b   :  { %v1163_v19 = vand.u32 4294901760, %v1162_v15 }
  0x6c   :  { %2549 = vmatpush3.bf16.msra.mxu1 %v2548_v40 }
  0x6d   :  { %2275 = vmatmul.mubr.f32.vlgmr.msra.gmra.mrb[0].mxu0 %v177_v7  ;;  %2550 = vmatprep.subr.bf16.mxu1 %v2885_v37 }
  0x6e   :  { %2278 = vmatpush3.msra.mxu0 %v111_v3  ;;  %2279 = vmatprep.mubr.msk.f32.mxu0 %vm2884_vm0, %v2883_v0 }
  0x6f   :  { %2282 = vmatprep.subr.mxu0 %v2883_v0 }
  0x75   :  { %2280 = vmatmul.mubr.f32.vlgmr.msra.gmra.mrb[0].mxu0 %v178_v9 }
  0x76   :  { %2283 = vmatpush3.msra.mxu0 %v189_v8  ;;  %2284 = vmatprep.mubr.msk.f32.mxu0 %vm2884_vm0, %v2883_v0  ;;  %v1082_v8 = vand.u32 4294901760, %v1061_v6 }
  0x77   :  { %2287 = vmatprep.subr.mxu0 %v2883_v0 }
  0x78   :  { %v1174_v13 = vsub.f32 %v1061_v6, %v1082_v8 }
  0x7a   :  { %v1175_v18 = vand.u32 4294901760, %v1174_v13 }
  0x7c   :  { %v1176_v21 = vsub.f32 %v1174_v13, %v1175_v18 }
  0x7d   :  { %2285 = vmatmul.mubr.f32.vlgmr.msra.gmra.mrb[0].mxu0 %v176_v5 }
  0x7e   :  { %2288 = vmatpush3.msra.mxu0 %v111_v3  ;;  %2289 = vmatprep.mubr.msk.f32.mxu0 %vm2884_vm0, %v2883_v0  ;;  %v1153_v3 = vsub.f32 %v1058_v61, %v1073_v63  ;;  %v1177_v24 = vand.u32 4294901760, %v1176_v21  ;;  %v1564_v61 = vld [vmem:[#allocation10 + $0x30] sm:$0xff] }
  0x7f   :  { %2538 = vmatprep.subr.bf16.mxu0 %v2885_v37 }
  0x80   :  { %v1154_v9 = vand.u32 4294901760, %v1153_v3  ;;  %v2587_v26 = vpack.c.bf16 %v1160_v4, %v1153_v3 }
  0x82   :  { %v1155_v14 = vsub.f32 %v1153_v3, %v1154_v9  ;;  %v2599_v28 = vpack.c.bf16 %v1161_v10, %v1154_v9 }
  0x84   :  { %v1156_v16 = vand.u32 4294901760, %v1155_v14 }
  0x85   :  { %2290 = vmatmul.mubr.f32.vlgmr.msra.gmra.mrb[0].mxu0 %v176_v5  ;;  %v1060_v5 = vld [vmem:[#allocation8 + $0x10] sm:$0xff] }
  0x86   :  { %2300 = vmatprep.mubr.msk.f32.mxu0 %vm2884_vm0, %v2883_v0  ;;  %2540 = vmatpush3.bf16.msra.mxu0 %v2539_v41  ;;  %v1079_v7 = vand.u32 4294901760, %v1060_v5  ;;  %v2581_v22 = vpack.c.bf16 %v1163_v19, %v1156_v16 }
  0x87   :  { %2541 = vmatprep.subr.bf16.mxu0 %v2885_v37 }
  0x88   :  { %v2578_v11 = vpack.c.bf16 %v1082_v8, %v1079_v7  ;;  %v1167_v12 = vsub.f32 %v1060_v5, %v1079_v7  ;;  %v1599_v5 = vand.u32 4294901760, %v1565_v1 }
  0x8a   :  { %2543 = vmatpush3.bf16.msra.mxu0 %v2542_v43  ;;  %v1168_v17 = vand.u32 4294901760, %v1167_v12  ;;  %v2590_v27 = vpack.c.bf16 %v1174_v13, %v1167_v12  ;;  %v1711_v9 = vsub.f32 %v1565_v1, %v1599_v5 }
  0x8b   :  { %2574 = vmatprep.subr.bf16.mxu0 %v2885_v37 }
  0x8c   :  { %v1169_v20 = vsub.f32 %v1167_v12, %v1168_v17  ;;  %v2602_v29 = vpack.c.bf16 %v1175_v18, %v1168_v17 }
  0x8e   :  { %v1170_v23 = vand.u32 4294901760, %v1169_v20 }
  0x90   :  { %v2584_v25 = vpack.c.bf16 %v1177_v24, %v1170_v23 }
 0x13a   :  { %v182_v47 = vpop.f32.mrb[0].mxu1 }
 0x13b   :  { %v2266_v48 = vpop.f32.mrb[1].mxu1  ;;  %v183_v50 = vadd.f32 %v2132_v49, %v182_v47 }
 0x158   :  { %v552_v51 = vpop.f32.mrb[0].mxu0 }
 0x159   :  { %v2683_v52 = vadd.f32 %v552_v51, %v183_v50  ;;  %v2291_v53 = vpop.f32.mrb[1].mxu0  ;;  %v1560_v51 = vld [vmem:[#allocation10 + $0x10] sm:$0xff] }
 0x15b   :  { %v556_v54 = vmax.f32 %v2683_v52, 0.0  ;;  %v1561_v52 = vld [vmem:[#allocation10 + $0x18] sm:$0xff] }
 0x15d   :  { %v570_v55 = vsel %vm568_vm2, %v556_v54, 0  ;;  %v1584_v54 = vand.u32 4294901760, %v1560_v51 }
 0x15e   :  { %v641_v56 = vand.u32 4294901760, %v570_v55 }
 0x160   :  { %v642_v57 = vsub.f32 %v570_v55, %v641_v56  ;;  %2312 = vmatmul.mubr.f32.vlgmr.msra.gmra.mrb[2].mxu1 %v641_v56  ;;  %v1587_v55 = vand.u32 4294901760, %v1561_v52 }
 0x161   :  { %2552 = vmatpush3.bf16.msra.mxu1 %v2551_v42  ;;  %2322 = vmatprep.mubr.msk.f32.mxu1 %vm2884_vm0, %v2883_v0 }
 0x162   :  { %v643_v58 = vand.u32 4294901760, %v642_v57  ;;  %2553 = vmatprep.subr.bf16.mxu1 %v2885_v37  ;;  %v3107_v4 = vpack.c.bf16 %v1587_v55, %v1584_v54 }
 0x164   :  { %v644_v59 = vsub.f32 %v642_v57, %v643_v58 }
 0x165   :  { %2555 = vmatpush3.bf16.msra.mxu1 %v2554_v44 }
 0x166   :  { %v645_v60 = vand.u32 4294901760, %v644_v59  ;;  %2556 = vmatprep.subr.bf16.mxu1 %v2885_v37  ;;  %v1562_v59 = vld [vmem:[#allocation10 + $0x20] sm:$0xff] }
 0x167   :  { %v1590_v62 = vand.u32 4294901760, %v1562_v59 }
 0x168   :  { %2301 = vmatmul.mubr.f32.vlgmr.msra.gmra.mrb[2].mxu0 %v645_v60  ;;  %2323 = vmatmul.mubr.f32.vlgmr.msra.gmra.mrb[2].mxu1 %v642_v57  ;;  %v3099_v57 = vsub.f32 %v1561_v52, %v1587_v55  ;;  %v1563_v60 = vld [vmem:[#allocation10 + $0x28] sm:$0xff] }
 0x169   :  { %2558 = vmatpush3.bf16.msra.mxu1 %v2539_v41  ;;  %2333 = vmatprep.mubr.msk.f32.mxu1 %vm2884_vm0, %v2883_v0  ;;  %v1593_v63 = vand.u32 4294901760, %v1563_v60  ;;  %v1690_v6 = vsub.f32 %v1562_v59, %v1590_v62 }
 0x16a   :  { %2559 = vmatprep.subr.bf16.mxu1 %v2885_v37  ;;  %2366 = vmatprep.mubr.msk.f32.mxu0 %vm2884_vm0, %v2883_v0  ;;  %v1684_v21 = vand.u32 4294901760, %v3099_v57 }
 0x16b   :  { %2576 = vmatpush3.bf16.msra.mxu0 %v3058_v2  ;;  %v1697_v7 = vsub.f32 %v1563_v60, %v1593_v63 }
 0x16c   :  { %2577 = vmatprep.subr.bf16.mxu0 %v2885_v37  ;;  %v1685_v24 = vsub.f32 %v3099_v57, %v1684_v21 }
 0x16d   :  { %2561 = vmatpush3.bf16.msra.mxu1 %v2542_v43  ;;  %v2641_v10 = vpack.c.bf16 %v1697_v7, %v1690_v6 }
 0x16e   :  { %2562 = vmatprep.subr.bf16.mxu1 %v2885_v37 }
 0x16f   :  { %2579 = vmatpush3.bf16.msra.mxu0 %v2578_v11 }
 0x170   :  { %2334 = vmatmul.mubr.f32.vlgmr.msra.gmra.mrb[2].mxu1 %v643_v58  ;;  %2580 = vmatprep.subr.bf16.mxu0 %v2885_v37 }
 0x171   :  { %2564 = vmatpush3.bf16.msra.mxu1 %v2563_v45  ;;  %2344 = vmatprep.mubr.msk.f32.mxu1 %vm2884_vm0, %v2883_v0  ;;  %v1558_v45 = vld [vmem:[#allocation10] sm:$0xff] }
 0x172   :  { %2565 = vmatprep.subr.bf16.mxu1 %v2885_v37  ;;  %v1578_v47 = vand.u32 4294901760, %v1558_v45 }
 0x174   :  { %v3091_v49 = vsub.f32 %v1558_v45, %v1578_v47 }
 0x175   :  { %2567 = vmatpush3.bf16.msra.mxu1 %v2566_v46  ;;  %v1559_v46 = vld [vmem:[#allocation10 + $0x8] sm:$0xff] }
 0x176   :  { %2568 = vmatprep.subr.bf16.mxu1 %v2885_v37  ;;  %v1581_v48 = vand.u32 4294901760, %v1559_v46  ;;  %v1663_v13 = vand.u32 4294901760, %v3091_v49 }
 0x178   :  { %2345 = vmatmul.mubr.f32.vlgmr.msra.gmra.mrb[2].mxu1 %v641_v56  ;;  %v3093_v50 = vsub.f32 %v1559_v46, %v1581_v48  ;;  %v3101_v58 = vpack.c.bf16 %v1581_v48, %v1578_v47  ;;  %v1664_v16 = vsub.f32 %v3091_v49, %v1663_v13  ;;  %v2134_v47 = vld [vmem:[%s3185_s6] ss:$0 sm:$0xff] }
 0x179   :  { %2570 = vmatpush3.bf16.msra.mxu1 %v2539_v41  ;;  %2355 = vmatprep.mubr.msk.f32.mxu1 %vm2884_vm0, %v2883_v0 }
 0x17a   :  { %2571 = vmatprep.subr.bf16.mxu1 %v2885_v37  ;;  %v2635_v53 = vpack.c.bf16 %v3093_v50, %v3091_v49  ;;  %v1670_v14 = vand.u32 4294901760, %v3093_v50  ;;  %v1665_v18 = vand.u32 4294901760, %v1664_v16 }
 0x17c   :  { %v1671_v17 = vsub.f32 %v3093_v50, %v1670_v14 }
 0x17d   :  { %2573 = vmatpush3.bf16.msra.mxu1 %v2542_v43 }
 0x17e   :  { %2634 = vmatprep.subr.bf16.mxu1 %v2885_v37  ;;  %v1672_v19 = vand.u32 4294901760, %v1671_v17 }
 0x180   :  { %2356 = vmatmul.mubr.f32.vlgmr.msra.gmra.mrb[2].mxu1 %v641_v56  ;;  %v3097_v56 = vsub.f32 %v1560_v51, %v1584_v54 }
 0x181   :  { %2478 = vmatprep.mubr.msk.f32.mxu1 %vm2884_vm0, %v2883_v0  ;;  %2636 = vmatpush3.bf16.msra.mxu1 %v2635_v53 }
 0x182   :  { %2637 = vmatprep.subr.bf16.mxu1 %v2885_v37  ;;  %v2638_v3 = vpack.c.bf16 %v3099_v57, %v3097_v56  ;;  %v1677_v20 = vand.u32 4294901760, %v3097_v56 }
 0x184   :  { %v1678_v23 = vsub.f32 %v3097_v56, %v1677_v20 }
 0x185   :  { %2639 = vmatpush3.bf16.msra.mxu1 %v2638_v3 }
 0x186   :  { %2640 = vmatprep.subr.bf16.mxu1 %v2885_v37 }
 0x189   :  { %2642 = vmatpush3.bf16.msra.mxu1 %v2641_v10 }
 0x18a   :  { %2643 = vmatprep.subr.bf16.mxu1 %v2885_v37 }
 0x23b   :  { %v647_v30 = vpop.f32.mrb[2].mxu0 }
 0x23c   :  { %v2302_v31 = vpop.f32.mrb[3].mxu0  ;;  %v648_v33 = vadd.f32 %v2133_v32, %v647_v30 }
 0x253   :  { %v1053_v34 = vpop.f32.mrb[2].mxu1 }
 0x254   :  { %v2685_v35 = vadd.f32 %v1053_v34, %v648_v33  ;;  %v2357_v36 = vpop.f32.mrb[3].mxu1 }
 0x256   :  { %v1057_v38 = vmax.f32 %v2685_v35, 0.0  ;;  %v1712_v35 = vand.u32 4294901760, %v1711_v9 }
 0x258   :  { %v1070_v39 = vsel %vm568_vm2, %v1057_v38, 0 }
 0x259   :  { %v1141_v40 = vand.u32 4294901760, %v1070_v39 }
 0x25b   :  { %v1142_v41 = vsub.f32 %v1070_v39, %v1141_v40  ;;  %v1713_v39 = vsub.f32 %v1711_v9, %v1712_v35 }
 0x25d   :  { %v1143_v42 = vand.u32 4294901760, %v1142_v41 }
 0x25f   :  { %v1144_v43 = vsub.f32 %v1142_v41, %v1143_v42 }
 0x261   :  { %v1145_v44 = vand.u32 4294901760, %v1144_v43 }
 0x263   :  { %2367 = vmatmul.mubr.f32.vlgmr.msra.gmra.mrb[4].mxu0 %v1145_v44  ;;  %v2662_v44 = vpack.c.bf16 %v1684_v21, %v1677_v20 }
 0x264   :  { %2582 = vmatpush3.bf16.msra.mxu0 %v2581_v22  ;;  %2377 = vmatprep.mubr.msk.f32.mxu0 %vm2884_vm0, %v2883_v0  ;;  %v2623_v22 = vpack.c.bf16 %v1672_v19, %v1665_v18 }
 0x265   :  { %2583 = vmatprep.subr.bf16.mxu0 %v2885_v37 }
 0x268   :  { %2585 = vmatpush3.bf16.msra.mxu0 %v2584_v25  ;;  %v1679_v25 = vand.u32 4294901760, %v1678_v23 }
 0x269   :  { %2586 = vmatprep.subr.bf16.mxu0 %v2885_v37 }
 0x26b   :  { %2378 = vmatmul.mubr.f32.vlgmr.msra.gmra.mrb[4].mxu0 %v1141_v40 }
 0x26c   :  { %2588 = vmatpush3.bf16.msra.mxu0 %v2587_v26  ;;  %2388 = vmatprep.mubr.msk.f32.mxu0 %vm2884_vm0, %v2883_v0  ;;  %v1686_v26 = vand.u32 4294901760, %v1685_v24 }
 0x26d   :  { %2589 = vmatprep.subr.bf16.mxu0 %v2885_v37 }
 0x270   :  { %2591 = vmatpush3.bf16.msra.mxu0 %v2590_v27  ;;  %v1691_v27 = vand.u32 4294901760, %v1690_v6 }
 0x271   :  { %2592 = vmatprep.subr.bf16.mxu0 %v2885_v37 }
 0x272   :  { %v1692_v30 = vsub.f32 %v1690_v6, %v1691_v27 }
 0x273   :  { %2389 = vmatmul.mubr.f32.vlgmr.msra.gmra.mrb[4].mxu0 %v1142_v41 }
 0x274   :  { %2594 = vmatpush3.bf16.msra.mxu0 %v3058_v2  ;;  %2399 = vmatprep.mubr.msk.f32.mxu0 %vm2884_vm0, %v2883_v0  ;;  %v1693_v32 = vand.u32 4294901760, %v1692_v30 }
 0x275   :  { %2595 = vmatprep.subr.bf16.mxu0 %v2885_v37 }
 0x278   :  { %2597 = vmatpush3.bf16.msra.mxu0 %v2578_v11 }
 0x279   :  { %2598 = vmatprep.subr.bf16.mxu0 %v2885_v37 }
 0x27b   :  { %2400 = vmatmul.mubr.f32.vlgmr.msra.gmra.mrb[4].mxu0 %v1143_v42  ;;  %v1714_v42 = vand.u32 4294901760, %v1713_v39 }
 0x27c   :  { %2600 = vmatpush3.bf16.msra.mxu0 %v2599_v28  ;;  %2410 = vmatprep.mubr.msk.f32.mxu0 %vm2884_vm0, %v2883_v0  ;;  %v1698_v28 = vand.u32 4294901760, %v1697_v7 }
 0x27d   :  { %2601 = vmatprep.subr.bf16.mxu0 %v2885_v37 }
 0x27e   :  { %v1699_v31 = vsub.f32 %v1697_v7, %v1698_v28  ;;  %v2665_v45 = vpack.c.bf16 %v1698_v28, %v1691_v27 }
 0x280   :  { %2603 = vmatpush3.bf16.msra.mxu0 %v2602_v29  ;;  %v2626_v29 = vpack.c.bf16 %v1686_v26, %v1679_v25  ;;  %v1700_v33 = vand.u32 4294901760, %v1699_v31 }
 0x281   :  { %2604 = vmatprep.subr.bf16.mxu0 %v2885_v37 }
 0x282   :  { %v2629_v36 = vpack.c.bf16 %v1700_v33, %v1693_v32 }
 0x283   :  { %2411 = vmatmul.mubr.f32.vlgmr.msra.gmra.mrb[4].mxu0 %v1141_v40 }
 0x284   :  { %2606 = vmatpush3.bf16.msra.mxu0 %v3058_v2  ;;  %2421 = vmatprep.mubr.msk.f32.mxu0 %vm2884_vm0, %v2883_v0  ;;  %v1596_v2 = vand.u32 4294901760, %v1564_v61 }
 0x285   :  { %2607 = vmatprep.subr.bf16.mxu0 %v2885_v37 }
 0x286   :  { %v1704_v8 = vsub.f32 %v1564_v61, %v1596_v2  ;;  %v3121_v15 = vpack.c.bf16 %v1599_v5, %v1596_v2 }
 0x288   :  { %2609 = vmatpush3.bf16.msra.mxu0 %v2578_v11  ;;  %v3112_v11 = vpack.c.bf16 %v1593_v63, %v1590_v62  ;;  %v2644_v12 = vpack.c.bf16 %v1711_v9, %v1704_v8  ;;  %v1705_v34 = vand.u32 4294901760, %v1704_v8 }
 0x289   :  { %2610 = vmatprep.subr.bf16.mxu0 %v2885_v37 }
 0x28a   :  { %2645 = vmatpush3.bf16.msra.mxu1 %v2644_v12  ;;  %v1706_v38 = vsub.f32 %v1704_v8, %v1705_v34  ;;  %v2668_v46 = vpack.c.bf16 %v1712_v35, %v1705_v34 }
 0x28b   :  { %2422 = vmatmul.mubr.f32.vlgmr.msra.gmra.mrb[4].mxu0 %v1141_v40  ;;  %2646 = vmatprep.subr.bf16.mxu1 %v2885_v37  ;;  %v2659_v40 = vpack.c.bf16 %v1670_v14, %v1663_v13 }
 0x28c   :  { %2440 = vmatprep.mubr.msk.f32.mxu0 %vm2884_vm0, %v2883_v0  ;;  %2612 = vmatpush3.bf16.msra.mxu0 %v3101_v58  ;;  %v1707_v41 = vand.u32 4294901760, %v1706_v38 }
 0x28d   :  { %2613 = vmatprep.subr.bf16.mxu0 %v2885_v37 }
 0x28e   :  { %v2632_v43 = vpack.c.bf16 %v1714_v42, %v1707_v41 }
 0x290   :  { %2615 = vmatpush3.bf16.msra.mxu0 %v3107_v4 }
 0x291   :  { %2616 = vmatprep.subr.bf16.mxu0 %v2885_v37 }
 0x294   :  { %2618 = vmatpush3.bf16.msra.mxu0 %v3112_v11 }
 0x295   :  { %2619 = vmatprep.subr.bf16.mxu0 %v2885_v37 }
 0x298   :  { %2621 = vmatpush3.bf16.msra.mxu0 %v3121_v15 }
 0x299   :  { %2622 = vmatprep.subr.bf16.mxu0 %v2885_v37 }
 0x35e   :  { %v1553_v48 = vpop.f32.mrb[4].mxu0 }
 0x35f   :  { %v2686_v49 = vadd.f32 %v2134_v47, %v1553_v48  ;;  %v2423_v50 = vpop.f32.mrb[5].mxu0 }
 0x361   :  { %2734 = vtanh.f32 %v2686_v49 }
 0x36b   :  { %v2735_v51 = vpop.eup %2734 }
 0x36c   :  { %v1575_v52 = vsel %vm1573_vm3, %v2735_v51, 0 }
 0x36d   :  { %v1650_v53 = vand.u32 4294901760, %v1575_v52 }
 0x36f   :  { %v1651_v54 = vsub.f32 %v1575_v52, %v1650_v53 }
 0x371   :  { %2479 = vmatmul.mubr.f32.vlgmr.msra.gmra.mrb[4].mxu1 %v1651_v54  ;;  %v1652_v55 = vand.u32 4294901760, %v1651_v54 }
 0x372   :  { %2648 = vmatpush3.bf16.msra.mxu1 %v3101_v58  ;;  %2497 = vmatprep.mubr.msk.f32.mxu1 %vm2884_vm0, %v2883_v0 }
 0x373   :  { %2649 = vmatprep.subr.bf16.mxu1 %v2885_v37  ;;  %v1653_v56 = vsub.f32 %v1651_v54, %v1652_v55 }
 0x375   :  { %v1654_v57 = vand.u32 4294901760, %v1653_v56 }
 0x376   :  { %2651 = vmatpush3.bf16.msra.mxu1 %v3107_v4 }
 0x377   :  { %2441 = vmatmul.mubr.f32.vlgmr.msra.gmra.mrb[6].mxu0 %v1654_v57  ;;  %2652 = vmatprep.subr.bf16.mxu1 %v2885_v37 }
 0x378   :  { %2624 = vmatpush3.bf16.msra.mxu0 %v2623_v22  ;;  %2459 = vmatprep.mubr.msk.f32.mxu0 %vm2884_vm0, %v2883_v0 }
 0x379   :  { %2625 = vmatprep.subr.bf16.mxu0 %v2885_v37 }
 0x37a   :  { %2654 = vmatpush3.bf16.msra.mxu1 %v3112_v11 }
 0x37b   :  { %2655 = vmatprep.subr.bf16.mxu1 %v2885_v37 }
 0x37c   :  { %2627 = vmatpush3.bf16.msra.mxu0 %v2626_v29 }
 0x37d   :  { %2628 = vmatprep.subr.bf16.mxu0 %v2885_v37 }
 0x37e   :  { %2657 = vmatpush3.bf16.msra.mxu1 %v3121_v15 }
 0x37f   :  { %2658 = vmatprep.subr.bf16.mxu1 %v2885_v37 }
 0x380   :  { %2630 = vmatpush3.bf16.msra.mxu0 %v2629_v36 }
 0x381   :  { %2498 = vmatmul.mubr.f32.vlgmr.msra.gmra.mrb[4].mxu1 %v1652_v55  ;;  %2631 = vmatprep.subr.bf16.mxu0 %v2885_v37 }
 0x382   :  { %2660 = vmatpush3.bf16.msra.mxu1 %v2659_v40  ;;  %2516 = vmatprep.mubr.msk.f32.mxu1 %vm2884_vm0, %v2883_v0 }
 0x383   :  { %2661 = vmatprep.subr.bf16.mxu1 %v2885_v37 }
 0x384   :  { %2633 = vmatpush3.bf16.msra.mxu0 %v2632_v43 }
 0x386   :  { %2663 = vmatpush3.bf16.msra.mxu1 %v2662_v44 }
 0x387   :  { %2460 = vmatmul.mubr.f32.vlgmr.msra.gmra.mrb[6].mxu0 %v1650_v53  ;;  %2664 = vmatprep.subr.bf16.mxu1 %v2885_v37 }
 0x38a   :  { %2666 = vmatpush3.bf16.msra.mxu1 %v2665_v45 }
 0x38b   :  { %2667 = vmatprep.subr.bf16.mxu1 %v2885_v37 }
 0x38e   :  { %2669 = vmatpush3.bf16.msra.mxu1 %v2668_v46 }
 0x38f   :  { %2670 = vmatprep.subr.bf16.mxu1 %v2885_v37 }
 0x391   :  { %2517 = vmatmul.mubr.f32.vlgmr.msra.gmra.mrb[4].mxu1 %v1650_v53 }
 0x392   :  { %2672 = vmatpush3.bf16.msra.mxu1 %v3101_v58  ;;  %2535 = vmatprep.mubr.msk.f32.mxu1 %vm2884_vm0, %v2883_v0  ;;  %v2135_v58 = vld [vmem:[%s3187_s8] ss:$0 sm:$0xff] }
 0x393   :  { %2673 = vmatprep.subr.bf16.mxu1 %v2885_v37 }
 0x396   :  { %2675 = vmatpush3.bf16.msra.mxu1 %v3107_v4 }
 0x397   :  { %2676 = vmatprep.subr.bf16.mxu1 %v2885_v37 }
 0x39a   :  { %2678 = vmatpush3.bf16.msra.mxu1 %v3112_v11 }
 0x39b   :  { %2679 = vmatprep.subr.bf16.mxu1 %v2885_v37 }
 0x39e   :  { %2681 = vmatpush3.bf16.msra.mxu1 %v3121_v15 }
 0x3a1   :  { %2536 = vmatmul.mubr.f32.vlgmr.msra.gmra.mrb[4].mxu1 %v1650_v53 }
 0x45a   :  { %v1767_v59 = vpop.f32.mrb[6].mxu0 }
 0x45b   :  { %v2461_v60 = vpop.f32.mrb[7].mxu0  ;;  %v2687_v0 = vadd.f32 %v2135_v58, %v1767_v59 }
 0x474   :  { %v2110_v61 = vpop.f32.mrb[4].mxu1 }
 0x475   :  { %v2688_v62 = vadd.f32 %v2687_v0, %v2110_v61  ;;  %v2537_v63 = vpop.f32.mrb[5].mxu1 }
 0x477   :  { %2114 = vst [vmem:[#allocation11] sm:$0x3] %v2688_v62 }
 0x478   :  { %2857 = shalt.err (!%p2854_p2)
}
 0x479   :  { %s2858_s13 = scalar_lea.hbm %s3188_s9, 32 }
 0x47a   :  { %p2859_p3 = scmp.ne.s32.totalorder %s3188_s9, %s2858_s13  ;;  %p2862_p4 = scmp.lt.u32.totalorder %s2858_s13, %s3188_s9 }
 0x47c   :  { %p2864_p5 = pnand %p2862_p4, %p2859_p3 }
 0x47e   :  { %2867 = shalt.err (!%p2864_p5)
}
 0x47f   :  { %2124 = dma.vmem_to_hbm [thread:$0]  %s2122_s29, 32, %s3188_s9, [#allocation4]  }
 0x480   :  { %2874 = dma.done.wait [#allocation4], 32  }
 0x481   :  { %2875 = vsyncadd [#allocation4], 4294967264 }
 0x482   :  { %2128 = vsyncpa [#allocation3], 1 }
 0x483   :  { %2129 = vsyncpa [#allocation6], 1 }
 0x484   :  { %2130 = vsyncpa [#allocation9], 1 }
 0x485   :  { %2131 = vsyncpa [#allocation4], 1 }

</bundles_post_ra>
